<compile_context>
chip_gen: v6e
topology: v6e:2x2x1
jax: 0.10.0
libtpu: 0.0.40
codegen_flags: <defaults>
</compile_context>

<pallas_src>
import functools

import jax
import jax.numpy as jnp
from jax import lax
from jax.experimental import pallas as pl
from jax.experimental.pallas import tpu as pltpu

EPS = 1e-5
LANE = 128


def _round_up(n, m):
    return ((n + m - 1) // m) * m


# ----------------------------------------------------------------------------
# Fused kernel
# ----------------------------------------------------------------------------
def _mxu_dot(a, b, use_bf16):
    if use_bf16:
        a = a.astype(jnp.bfloat16)
        b = b.astype(jnp.bfloat16)
    return jnp.dot(a, b, preferred_element_type=jnp.float32)


def _batchnorm_train(h, gamma, beta):
    """PyTorch BatchNorm1d training-mode normalization (biased variance).

    Fused scale/shift form: only 2 full-size (B,F) VPU ops; the per-feature
    scale/shift rows are tiny (1,F) and rsqrt goes to the EUP slot.
    """
    mean = jnp.mean(h, axis=0, keepdims=True)          # sublane reduce -> XLU
    diff = h - mean
    var = jnp.mean(diff * diff, axis=0, keepdims=True)
    scale = gamma * lax.rsqrt(var + EPS)               # (1,F) row, EUP rsqrt
    shift = beta - mean * scale                        # (1,F) row
    return h * scale + shift                           # (B,F): 1 mul + 1 add


def _fused_decoder_kernel(*refs, num_hidden, use_bf16):
    """refs = [x, (w_i, vec_i) * num_hidden, gb_last, w_last, b_last, out].

    vec_i rows: 0=bias, 1=gamma, 2=beta  (hidden layers: Linear->ReLU->BN)
    gb_last rows: 0=gamma, 1=beta        (last layer:   BN->Linear)
    """
    o_ref = refs[-1]
    h = refs[0][...]

    idx = 1
    for _ in range(num_hidden):
        w_ref, v_ref = refs[idx], refs[idx + 1]
        idx += 2
        h = _mxu_dot(h, w_ref[...], use_bf16) + v_ref[0:1, :]
        h = jnp.maximum(h, 0.0)
        h = _batchnorm_train(h, v_ref[1:2, :], v_ref[2:3, :])

    gb_ref, w_ref, b_ref = refs[idx], refs[idx + 1], refs[idx + 2]
    h = _batchnorm_train(h, gb_ref[0:1, :], gb_ref[1:2, :])
    o_ref[...] = (_mxu_dot(h, w_ref[...], use_bf16) + b_ref[...]).astype(o_ref.dtype)


# ----------------------------------------------------------------------------
# Wrapper
# ----------------------------------------------------------------------------
@functools.partial(jax.jit, static_argnames=("output_size", "use_bf16_matmul"))
def decoder_forward(x, packed_params, output_size, use_bf16_matmul=False):
    B, din = x.shape
    num_hidden = len(packed_params) - 1

    din_p = packed_params[0]["w"].shape[0]
    if din_p != din:
        x = jnp.pad(x, ((0, 0), (0, din_p - din)))    # zero cols hit zero weight rows

    last = packed_params[-1]
    dout_p = last["w"].shape[1]

    inputs = [x]
    for p in packed_params[:-1]:
        inputs += [p["w"], p["vec"]]
    inputs += [last["gb"], last["w"], last["b"]]

    vmem = pl.BlockSpec(memory_space=pltpu.MemorySpace.VMEM)
    kernel = functools.partial(_fused_decoder_kernel,
                               num_hidden=num_hidden,
                               use_bf16=use_bf16_matmul)

    out_p = pl.pallas_call(
        kernel,
        out_shape=jax.ShapeDtypeStruct((B, dout_p), jnp.float32),
        in_specs=[vmem] * len(inputs),
        out_specs=vmem,
    )(*inputs)

    # Padded output columns are exact zeros; slice off to the true output size.
    return out_p[:, :output_size]

# NOTE: for realistic sizes (batch in the thousands, hidden >= 1024) this fused
# whole-array design should be restructured as a batch-tiled grid with two-pass
# BN (accumulate per-feature sum/sumsq, then normalize), budgeted for v7x's
# 64 MiB VMEM and with a "parallel" batch axis to use both v7x TensorCores.


# ----------------------------------------------------------------------------
# Parameter construction (deterministic, mimics nn.Linear default init ranges)
# ----------------------------------------------------------------------------
def init_decoder_params(key, layer_sizes, input_size, output_size):
    sizes = [input_size] + list(layer_sizes) + [output_size]
    params = []
    for l_id in range(len(sizes) - 1):
        fan_in, fan_out = sizes[l_id], sizes[l_id + 1]
        key, kw, kb = jax.random.split(key, 3)
        bound = 1.0 / jnp.sqrt(fan_in)
        # PyTorch Linear weight is (out, in); stored transposed as (in, out).
        w = jax.random.uniform(kw, (fan_in, fan_out), jnp.float32, -bound, bound)
        b = jax.random.uniform(kb, (1, fan_out), jnp.float32, -bound, bound)
        if l_id == len(sizes) - 2:
            # last layer: BatchNorm1d(fan_in) then Linear
            gamma = jnp.ones((1, fan_in), jnp.float32)
            beta = jnp.zeros((1, fan_in), jnp.float32)
        else:
            # Linear -> ReLU -> BatchNorm1d(fan_out)
            gamma = jnp.ones((1, fan_out), jnp.float32)
            beta = jnp.zeros((1, fan_out), jnp.float32)
        params.append(dict(w=w, b=b, gamma=gamma, beta=beta))
    return params


def pack_params(params):
    """Zero-pad feature dims to 128-lane multiples and pack per-layer vectors."""
    n = len(params)
    packed = []
    for i, p in enumerate(params):
        din, dout = p["w"].shape
        din_p, dout_p = _round_up(din, LANE), _round_up(dout, LANE)
        w_p = jnp.pad(p["w"], ((0, din_p - din), (0, dout_p - dout)))
        if i < n - 1:
            vec = jnp.concatenate([p["b"], p["gamma"], p["beta"]], axis=0)  # (3, dout)
            vec_p = jnp.pad(vec, ((0, 0), (0, dout_p - dout)))
            packed.append(dict(w=w_p, vec=vec_p))
        else:
            gb = jnp.concatenate([p["gamma"], p["beta"]], axis=0)           # (2, din)
            gb_p = jnp.pad(gb, ((0, 0), (0, din_p - din)))
            b_p = jnp.pad(p["b"], ((0, 0), (0, dout_p - dout)))
            packed.append(dict(gb=gb_p, w=w_p, b=b_p))
    return packed


# ----------------------------------------------------------------------------
# Pure-JAX reference for sanity checking
# ----------------------------------------------------------------------------
def decoder_forward_ref(x, params):
    n = len(params)
    for l_id, p in enumerate(params):
        if l_id == n - 1:
            mean = jnp.mean(x, axis=0, keepdims=True)
            var = jnp.mean((x - mean) ** 2, axis=0, keepdims=True)
            xn = (x - mean) / jnp.sqrt(var + EPS) * p["gamma"] + p["beta"]
            x = xn @ p["w"] + p["b"]
        else:
            h = jnp.maximum(x @ p["w"] + p["b"], 0.0)
            mean = jnp.mean(h, axis=0, keepdims=True)
            var = jnp.mean((h - mean) ** 2, axis=0, keepdims=True)
            x = (h - mean) / jnp.sqrt(var + EPS) * p["gamma"] + p["beta"]
    return x


if __name__ == "__main__":
    key = jax.random.PRNGKey(0)
    batch = 8
    input_size = 32
    layer_sizes = [64, 48]
    output_size = 16

    kx, kp = jax.random.split(key)
    x = jax.random.normal(kx, (batch, input_size), jnp.float32)
    params = init_decoder_params(kp, layer_sizes, input_size, output_size)
    packed = pack_params(params)

    # use_bf16_matmul=True is the v6e/v7x throughput path (relax tolerance ~2e-2);
    # default False keeps exact f32 parity with the PyTorch module.
    out = decoder_forward(x, packed, output_size=output_size)
    out = jax.block_until_ready(out)

    ref = decoder_forward_ref(x, params)
    assert out.shape == (batch, output_size)
    assert jnp.allclose(out, ref, atol=1e-4, rtol=1e-4), "mismatch vs JAX reference"

    # TODO(synk): running_mean/running_var buffer updates of nn.BatchNorm1d are
    # stateful training bookkeeping and are not part of the forward output.

    print("KERNEL_OK")
</pallas_src>

<mosaic_0001>
module attributes {stable_mosaic.version = 11 : i64} {
  func.func @_fused_decoder_kernel(%arg0: memref<8x128xf32, #tpu.memory_space<vmem>>, %arg1: memref<128x128xf32, #tpu.memory_space<vmem>>, %arg2: memref<3x128xf32, #tpu.memory_space<vmem>>, %arg3: memref<128x128xf32, #tpu.memory_space<vmem>>, %arg4: memref<3x128xf32, #tpu.memory_space<vmem>>, %arg5: memref<2x128xf32, #tpu.memory_space<vmem>>, %arg6: memref<128x128xf32, #tpu.memory_space<vmem>>, %arg7: memref<1x128xf32, #tpu.memory_space<vmem>>, %arg8: memref<8x128xf32, #tpu.memory_space<vmem>>) attributes {dimension_semantics = [], scalar_prefetch = 0 : i64, scratch_operands = 0 : i64, tpu.core_type = #tpu.core_type<tc>} {
    %c0 = arith.constant 0 : index
    %c0_0 = arith.constant 0 : index
    %0 = vector.load %arg0[%c0, %c0_0] : memref<8x128xf32, #tpu.memory_space<vmem>>, vector<8x128xf32>
    %c0_1 = arith.constant 0 : index
    %c0_2 = arith.constant 0 : index
    %1 = vector.load %arg1[%c0_1, %c0_2] : memref<128x128xf32, #tpu.memory_space<vmem>>, vector<128x128xf32>
    %cst = arith.constant dense<0.000000e+00> : vector<8x128xf32>
    %2 = tpu.matmul %0, %1, %cst {dimension_numbers = #tpu.dot_dimension_numbers<[1], [0], [0], [1], [0, 0, 1, 1], [], []>} : vector<8x128xf32>, vector<128x128xf32>, vector<8x128xf32> -> vector<8x128xf32>
    %c0_3 = arith.constant 0 : index
    %c0_4 = arith.constant 0 : index
    %3 = vector.load %arg2[%c0_3, %c0_4] : memref<3x128xf32, #tpu.memory_space<vmem>>, vector<1x128xf32>
    %4 = vector.broadcast %3 : vector<1x128xf32> to vector<8x128xf32>
    %5 = arith.addf %2, %4 : vector<8x128xf32>
    %cst_5 = arith.constant 0.000000e+00 : f32
    %6 = vector.broadcast %cst_5 : f32 to vector<8x128xf32>
    %7 = arith.maximumf %5, %6 : vector<8x128xf32>
    %c1 = arith.constant 1 : index
    %c0_6 = arith.constant 0 : index
    %8 = vector.load %arg2[%c1, %c0_6] : memref<3x128xf32, #tpu.memory_space<vmem>>, vector<1x128xf32>
    %c2 = arith.constant 2 : index
    %c0_7 = arith.constant 0 : index
    %9 = vector.load %arg2[%c2, %c0_7] : memref<3x128xf32, #tpu.memory_space<vmem>>, vector<1x128xf32>
    %cst_8 = arith.constant dense<0.000000e+00> : vector<128xf32>
    %10 = vector.multi_reduction <add>, %7, %cst_8 [0] : vector<8x128xf32> to vector<128xf32>
    %11 = vector.shape_cast %10 : vector<128xf32> to vector<1x128xf32>
    %cst_9 = arith.constant 8.000000e+00 : f32
    %12 = vector.broadcast %cst_9 : f32 to vector<1x128xf32>
    %13 = arith.divf %11, %12 : vector<1x128xf32>
    %14 = vector.broadcast %13 : vector<1x128xf32> to vector<8x128xf32>
    %15 = arith.subf %7, %14 : vector<8x128xf32>
    %16 = arith.mulf %15, %15 : vector<8x128xf32>
    %cst_10 = arith.constant dense<0.000000e+00> : vector<128xf32>
    %17 = vector.multi_reduction <add>, %16, %cst_10 [0] : vector<8x128xf32> to vector<128xf32>
    %18 = vector.shape_cast %17 : vector<128xf32> to vector<1x128xf32>
    %cst_11 = arith.constant 8.000000e+00 : f32
    %19 = vector.broadcast %cst_11 : f32 to vector<1x128xf32>
    %20 = arith.divf %18, %19 : vector<1x128xf32>
    %cst_12 = arith.constant 9.99999974E-6 : f32
    %21 = vector.broadcast %cst_12 : f32 to vector<1x128xf32>
    %22 = arith.addf %20, %21 : vector<1x128xf32>
    %23 = math.rsqrt %22 : vector<1x128xf32>
    %24 = arith.mulf %8, %23 : vector<1x128xf32>
    %25 = arith.mulf %13, %24 : vector<1x128xf32>
    %26 = arith.subf %9, %25 : vector<1x128xf32>
    %27 = vector.broadcast %24 : vector<1x128xf32> to vector<8x128xf32>
    %28 = arith.mulf %7, %27 : vector<8x128xf32>
    %29 = vector.broadcast %26 : vector<1x128xf32> to vector<8x128xf32>
    %30 = arith.addf %28, %29 : vector<8x128xf32>
    %c0_13 = arith.constant 0 : index
    %c0_14 = arith.constant 0 : index
    %31 = vector.load %arg3[%c0_13, %c0_14] : memref<128x128xf32, #tpu.memory_space<vmem>>, vector<128x128xf32>
    %cst_15 = arith.constant dense<0.000000e+00> : vector<8x128xf32>
    %32 = tpu.matmul %30, %31, %cst_15 {dimension_numbers = #tpu.dot_dimension_numbers<[1], [0], [0], [1], [0, 0, 1, 1], [], []>} : vector<8x128xf32>, vector<128x128xf32>, vector<8x128xf32> -> vector<8x128xf32>
    %c0_16 = arith.constant 0 : index
    %c0_17 = arith.constant 0 : index
    %33 = vector.load %arg4[%c0_16, %c0_17] : memref<3x128xf32, #tpu.memory_space<vmem>>, vector<1x128xf32>
    %34 = vector.broadcast %33 : vector<1x128xf32> to vector<8x128xf32>
    %35 = arith.addf %32, %34 : vector<8x128xf32>
    %cst_18 = arith.constant 0.000000e+00 : f32
    %36 = vector.broadcast %cst_18 : f32 to vector<8x128xf32>
    %37 = arith.maximumf %35, %36 : vector<8x128xf32>
    %c1_19 = arith.constant 1 : index
    %c0_20 = arith.constant 0 : index
    %38 = vector.load %arg4[%c1_19, %c0_20] : memref<3x128xf32, #tpu.memory_space<vmem>>, vector<1x128xf32>
    %c2_21 = arith.constant 2 : index
    %c0_22 = arith.constant 0 : index
    %39 = vector.load %arg4[%c2_21, %c0_22] : memref<3x128xf32, #tpu.memory_space<vmem>>, vector<1x128xf32>
    %cst_23 = arith.constant dense<0.000000e+00> : vector<128xf32>
    %40 = vector.multi_reduction <add>, %37, %cst_23 [0] : vector<8x128xf32> to vector<128xf32>
    %41 = vector.shape_cast %40 : vector<128xf32> to vector<1x128xf32>
    %cst_24 = arith.constant 8.000000e+00 : f32
    %42 = vector.broadcast %cst_24 : f32 to vector<1x128xf32>
    %43 = arith.divf %41, %42 : vector<1x128xf32>
    %44 = vector.broadcast %43 : vector<1x128xf32> to vector<8x128xf32>
    %45 = arith.subf %37, %44 : vector<8x128xf32>
    %46 = arith.mulf %45, %45 : vector<8x128xf32>
    %cst_25 = arith.constant dense<0.000000e+00> : vector<128xf32>
    %47 = vector.multi_reduction <add>, %46, %cst_25 [0] : vector<8x128xf32> to vector<128xf32>
    %48 = vector.shape_cast %47 : vector<128xf32> to vector<1x128xf32>
    %cst_26 = arith.constant 8.000000e+00 : f32
    %49 = vector.broadcast %cst_26 : f32 to vector<1x128xf32>
    %50 = arith.divf %48, %49 : vector<1x128xf32>
    %cst_27 = arith.constant 9.99999974E-6 : f32
    %51 = vector.broadcast %cst_27 : f32 to vector<1x128xf32>
    %52 = arith.addf %50, %51 : vector<1x128xf32>
    %53 = math.rsqrt %52 : vector<1x128xf32>
    %54 = arith.mulf %38, %53 : vector<1x128xf32>
    %55 = arith.mulf %43, %54 : vector<1x128xf32>
    %56 = arith.subf %39, %55 : vector<1x128xf32>
    %57 = vector.broadcast %54 : vector<1x128xf32> to vector<8x128xf32>
    %58 = arith.mulf %37, %57 : vector<8x128xf32>
    %59 = vector.broadcast %56 : vector<1x128xf32> to vector<8x128xf32>
    %60 = arith.addf %58, %59 : vector<8x128xf32>
    %c0_28 = arith.constant 0 : index
    %c0_29 = arith.constant 0 : index
    %61 = vector.load %arg5[%c0_28, %c0_29] : memref<2x128xf32, #tpu.memory_space<vmem>>, vector<1x128xf32>
    %c1_30 = arith.constant 1 : index
    %c0_31 = arith.constant 0 : index
    %62 = vector.load %arg5[%c1_30, %c0_31] : memref<2x128xf32, #tpu.memory_space<vmem>>, vector<1x128xf32>
    %cst_32 = arith.constant dense<0.000000e+00> : vector<128xf32>
    %63 = vector.multi_reduction <add>, %60, %cst_32 [0] : vector<8x128xf32> to vector<128xf32>
    %64 = vector.shape_cast %63 : vector<128xf32> to vector<1x128xf32>
    %cst_33 = arith.constant 8.000000e+00 : f32
    %65 = vector.broadcast %cst_33 : f32 to vector<1x128xf32>
    %66 = arith.divf %64, %65 : vector<1x128xf32>
    %67 = vector.broadcast %66 : vector<1x128xf32> to vector<8x128xf32>
    %68 = arith.subf %60, %67 : vector<8x128xf32>
    %69 = arith.mulf %68, %68 : vector<8x128xf32>
    %cst_34 = arith.constant dense<0.000000e+00> : vector<128xf32>
    %70 = vector.multi_reduction <add>, %69, %cst_34 [0] : vector<8x128xf32> to vector<128xf32>
    %71 = vector.shape_cast %70 : vector<128xf32> to vector<1x128xf32>
    %cst_35 = arith.constant 8.000000e+00 : f32
    %72 = vector.broadcast %cst_35 : f32 to vector<1x128xf32>
    %73 = arith.divf %71, %72 : vector<1x128xf32>
    %cst_36 = arith.constant 9.99999974E-6 : f32
    %74 = vector.broadcast %cst_36 : f32 to vector<1x128xf32>
    %75 = arith.addf %73, %74 : vector<1x128xf32>
    %76 = math.rsqrt %75 : vector<1x128xf32>
    %77 = arith.mulf %61, %76 : vector<1x128xf32>
    %78 = arith.mulf %66, %77 : vector<1x128xf32>
    %79 = arith.subf %62, %78 : vector<1x128xf32>
    %80 = vector.broadcast %77 : vector<1x128xf32> to vector<8x128xf32>
    %81 = arith.mulf %60, %80 : vector<8x128xf32>
    %82 = vector.broadcast %79 : vector<1x128xf32> to vector<8x128xf32>
    %83 = arith.addf %81, %82 : vector<8x128xf32>
    %c0_37 = arith.constant 0 : index
    %c0_38 = arith.constant 0 : index
    %84 = vector.load %arg6[%c0_37, %c0_38] : memref<128x128xf32, #tpu.memory_space<vmem>>, vector<128x128xf32>
    %cst_39 = arith.constant dense<0.000000e+00> : vector<8x128xf32>
    %85 = tpu.matmul %83, %84, %cst_39 {dimension_numbers = #tpu.dot_dimension_numbers<[1], [0], [0], [1], [0, 0, 1, 1], [], []>} : vector<8x128xf32>, vector<128x128xf32>, vector<8x128xf32> -> vector<8x128xf32>
    %c0_40 = arith.constant 0 : index
    %c0_41 = arith.constant 0 : index
    %86 = vector.load %arg7[%c0_40, %c0_41] : memref<1x128xf32, #tpu.memory_space<vmem>>, vector<1x128xf32>
    %87 = vector.broadcast %86 : vector<1x128xf32> to vector<8x128xf32>
    %88 = arith.addf %85, %87 : vector<8x128xf32>
    %c0_42 = arith.constant 0 : index
    %c0_43 = arith.constant 0 : index
    %89 = vector.load %arg8[%c0_42, %c0_43] : memref<8x128xf32, #tpu.memory_space<vmem>>, vector<8x128xf32>
    tpu.vector_store %arg8[%c0_42, %c0_43], %88 {strides = array<i32>} : memref<8x128xf32, #tpu.memory_space<vmem>>, vector<8x128xf32>,
    return
  }
}

</mosaic_0001>

<bundles_post_ra>
// kernel: decoder_forward.1
= control target key start
LH: loop header
LB: loop body
LE: loop exit
PB: predicated region body
PF: predicated region fallthrough
CT: control target
= control target key end

     0   :  { %13 = vsyncpa [#allocation3], 0  ;;  %s882_s0 = inlined_call_operand.vmem [shape: f32[8,128], index: 0, kind: input, shape index: {}]   ;;  %s883_s1 = inlined_call_operand.hbm [shape: f32[128,128], index: 1, kind: input, shape index: {}]   ;;  %s884_s2 = inlined_call_operand.vmem [shape: f32[3,128], index: 2, kind: input, shape index: {}]   ;;  %s885_s3 = inlined_call_operand.hbm [shape: f32[128,128], index: 3, kind: input, shape index: {}]   ;;  %s886_s4 = inlined_call_operand.vmem [shape: f32[3,128], index: 4, kind: input, shape index: {}]   ;;  %s887_s5 = inlined_call_operand.vmem [shape: f32[2,128], index: 5, kind: input, shape index: {}]   ;;  %s888_s6 = inlined_call_operand.hbm [shape: f32[128,128], index: 6, kind: input, shape index: {}]   ;;  %s889_s7 = inlined_call_operand.vmem [shape: f32[1,128], index: 7, kind: input, shape index: {}]   ;;  %s890_s8 = inlined_call_operand.hbm [shape: f32[8,128], index: 8, kind: output, shape index: {}]  }
   0x1   :  { %14 = vsyncpa [#allocation6], 0 }
   0x2   :  { %15 = vsyncpa [#allocation4], 0  ;;  %s725_s27 = smov [#allocation5]   ;;  %s726_s29 = smov [#allocation2]  }
   0x3   :  { %s37_s28 = sshll.u32 %s725_s27, 4  ;;  %s23_s30 = sshll.u32 %s726_s29, 4  ;;  %s38_s28 = int_to_ptr.vmem [resolvable:$true] %s37_s28  ;;  %s24_s30 = int_to_ptr.vmem [resolvable:$true] %s23_s30 }
   0x4   :  { %s647_s9 = scalar_lea.vmem %s38_s28, 2048  ;;  %p652_p1 = scmp.lt.s32.totalorder %s38_s28, %s38_s28 }
   0x5   :  { %p648_p0 = scmp.ne.s32.totalorder %s38_s28, %s647_s9  ;;  %p653_p2 = scmp.lt.s32.totalorder %s647_s9, %s647_s9 }
   0x7   :  { %p654_p3 = por %p653_p2, %p652_p1 }
   0x9   :  { %p655_p4 = pnand %p654_p3, %p648_p0 }
   0xb   :  { %658 = shalt.err (!%p655_p4)
}
   0xc   :  { %s727_s10 = smov 128   ;;  %s728_s11 = smov 8  }
   0xd   :  { %43 = dma.hbm_to_vmem [thread:$0]  %s885_s3, 2048, %s38_s28, [#allocation6], %s727_s10, %s727_s10, %s728_s11  }
   0xe   :  { %s667_s14 = scalar_lea.vmem %s24_s30, 2048  ;;  %p672_p6 = scmp.lt.s32.totalorder %s24_s30, %s24_s30 }
   0xf   :  { %p668_p5 = scmp.ne.s32.totalorder %s24_s30, %s667_s14  ;;  %p673_p7 = scmp.lt.s32.totalorder %s667_s14, %s667_s14 }
  0x11   :  { %p674_p8 = por %p673_p7, %p672_p6 }
  0x13   :  { %p675_p9 = pnand %p674_p8, %p668_p5 }
  0x15   :  { %678 = shalt.err (!%p675_p9)
}
  0x16   :  { %29 = dma.hbm_to_vmem [thread:$0]  %s883_s1, 2048, %s24_s30, [#allocation3], %s727_s10, %s727_s10, %s728_s11  }
  0x17   :  { %s729_s17 = smov [#allocation7]  }
  0x18   :  { %s53_s18 = sshll.u32 %s729_s17, 4  ;;  %s54_s18 = int_to_ptr.vmem [resolvable:$true] %s53_s18 }
  0x19   :  { %s687_s19 = scalar_lea.vmem %s54_s18, 2048  ;;  %p692_p11 = scmp.lt.s32.totalorder %s54_s18, %s54_s18 }
  0x1a   :  { %p688_p10 = scmp.ne.s32.totalorder %s54_s18, %s687_s19  ;;  %p693_p12 = scmp.lt.s32.totalorder %s687_s19, %s687_s19 }
  0x1c   :  { %p694_p13 = por %p693_p12, %p692_p11 }
  0x1e   :  { %p695_p0 = pnand %p694_p13, %p688_p10 }
  0x20   :  { %698 = shalt.err (!%p695_p0)
}
  0x21   :  { %59 = dma.hbm_to_vmem [thread:$0]  %s888_s6, 2048, %s54_s18, [#allocation6], %s727_s10, %s727_s10, %s728_s11  }
  0x22   :  { %719 = dma.done.wait [#allocation3], 2048  }
  0x23   :  { %720 = vsyncadd [#allocation3], 4294965248 }
  0x24   :  { %721 = dma.done.wait [#allocation6], 4096  }
  0x25   :  { %722 = vsyncadd [#allocation6], 4294963200  ;;  %v730_v0 = vmov 0.0   ;;  %vm731_vm0 = vmmov 0   ;;  %v87_v1 = vld [vmem:[#allocation2 + $0x78] sm:$0xff]  ;;  %v86_v2 = vld [vmem:[#allocation2 + $0x70] sm:$0xff]  ;;  %v188_v56 = vlaneseq }
  0x26   :  { %520 = vmatprep.subr.mxu0 %v730_v0  ;;  %552 = vmatprep.mubr.msk.f32.mxu0 %vm731_vm0, %v730_v0  ;;  %v85_v3 = vld [vmem:[#allocation2 + $0x68] sm:$0xff]  ;;  %v84_v4 = vld [vmem:[#allocation2 + $0x60] sm:$0xff]  ;;  %v83_v5 = vld [vmem:[#allocation2 + $0x58] sm:$0xff]  ;;  %s732_s14 = smov [#allocation8]  }
  0x27   :  { %555 = vmatprep.subr.mxu1 %v730_v0  ;;  %587 = vmatprep.mubr.msk.f32.mxu1 %vm731_vm0, %v730_v0  ;;  %v82_v6 = vld [vmem:[#allocation2 + $0x50] sm:$0xff]  ;;  %v81_v7 = vld [vmem:[#allocation2 + $0x48] sm:$0xff]  ;;  %v80_v8 = vld [vmem:[#allocation2 + $0x40] sm:$0xff]  ;;  %v189_v57 = vshrl.u32 %v188_v56, 7  ;;  %s456_s15 = sshll.u32 %s732_s14, 4  ;;  %s457_s15 = int_to_ptr.vmem [resolvable:$true] %s456_s15 }
  0x28   :  { %521 = vmatpush3.msra.mxu0 %v87_v1  ;;  %v79_v9 = vld [vmem:[#allocation2 + $0x38] sm:$0xff]  ;;  %v78_v10 = vld [vmem:[#allocation2 + $0x30] sm:$0xff]  ;;  %v77_v11 = vld [vmem:[#allocation2 + $0x28] sm:$0xff]  ;;  %p704_p2 = scmp.lt.s32.totalorder %s457_s15, %s457_s15 }
  0x29   :  { %522 = vmatprep.subr.mxu0 %v730_v0  ;;  %v76_v12 = vld [vmem:[#allocation2 + $0x20] sm:$0xff]  ;;  %v75_v13 = vld [vmem:[#allocation2 + $0x18] sm:$0xff]  ;;  %v74_v14 = vld [vmem:[#allocation2 + $0x10] sm:$0xff]  ;;  %v835_v59 = vsub.s32 0, %v189_v57 }
  0x2a   :  { %523 = vmatpush3.msra.mxu0 %v86_v2  ;;  %v73_v15 = vld [vmem:[#allocation2 + $0x8] sm:$0xff]  ;;  %v72_v16 = vld [vmem:[#allocation2] sm:$0xff]  ;;  %v213_v18 = vld [vmem:[#allocation5 + $0x78] sm:$0xff] }
  0x2b   :  { %524 = vmatprep.subr.mxu0 %v730_v0  ;;  %v71_v17 = vld [vmem:[%s882_s0] sm:$0xff]  ;;  %556 = vmatpush3.msra.mxu1 %v213_v18  ;;  %v212_v19 = vld [vmem:[#allocation5 + $0x70] sm:$0xff]  ;;  %v211_v20 = vld [vmem:[#allocation5 + $0x68] sm:$0xff] }
  0x2c   :  { %525 = vmatpush3.msra.mxu0 %v85_v3  ;;  %557 = vmatprep.subr.mxu1 %v730_v0  ;;  %v210_v21 = vld [vmem:[#allocation5 + $0x60] sm:$0xff]  ;;  %v209_v22 = vld [vmem:[#allocation5 + $0x58] sm:$0xff]  ;;  %v208_v23 = vld [vmem:[#allocation5 + $0x50] sm:$0xff] }
  0x2d   :  { %526 = vmatprep.subr.mxu0 %v730_v0  ;;  %558 = vmatpush3.msra.mxu1 %v212_v19  ;;  %v207_v24 = vld [vmem:[#allocation5 + $0x48] sm:$0xff]  ;;  %v206_v25 = vld [vmem:[#allocation5 + $0x40] sm:$0xff]  ;;  %v205_v26 = vld [vmem:[#allocation5 + $0x38] sm:$0xff] }
  0x2e   :  { %527 = vmatpush3.msra.mxu0 %v84_v4  ;;  %559 = vmatprep.subr.mxu1 %v730_v0  ;;  %v204_v27 = vld [vmem:[#allocation5 + $0x30] sm:$0xff]  ;;  %v203_v28 = vld [vmem:[#allocation5 + $0x28] sm:$0xff]  ;;  %v202_v29 = vld [vmem:[#allocation5 + $0x20] sm:$0xff] }
  0x2f   :  { %528 = vmatprep.subr.mxu0 %v730_v0  ;;  %560 = vmatpush3.msra.mxu1 %v211_v20  ;;  %v201_v30 = vld [vmem:[#allocation5 + $0x18] sm:$0xff]  ;;  %v200_v31 = vld [vmem:[#allocation5 + $0x10] sm:$0xff]  ;;  %v199_v32 = vld [vmem:[#allocation5 + $0x8] sm:$0xff] }
  0x30   :  { %529 = vmatpush3.msra.mxu0 %v83_v5  ;;  %561 = vmatprep.subr.mxu1 %v730_v0  ;;  %v198_v33 = vld [vmem:[#allocation5] sm:$0xff]  ;;  %v359_v18 = vld [vmem:[#allocation7 + $0x18] sm:$0xff]  ;;  %v358_v19 = vld [vmem:[#allocation7 + $0x10] sm:$0xff] }
  0x31   :  { %530 = vmatprep.subr.mxu0 %v730_v0  ;;  %562 = vmatpush3.msra.mxu1 %v210_v21  ;;  %v466_v34 = vld [vmem:[%s884_s2] ss:$0 sm:$0xff]  ;;  %v164_v58 = vld [vmem:[%s884_s2 + $0x1] sm:$0x1]  ;;  %v165_v62 = vld [vmem:[%s884_s2 + $0x2] sm:$0x1] }
  0x32   :  { %531 = vmatpush3.msra.mxu0 %v82_v6  ;;  %563 = vmatprep.subr.mxu1 %v730_v0  ;;  %v371_v6 = vld [vmem:[#allocation7 + $0x78] sm:$0xff]  ;;  %v357_v20 = vld [vmem:[#allocation7 + $0x8] sm:$0xff]  ;;  %v356_v21 = vld [vmem:[#allocation7] sm:$0xff] }
  0x33   :  { %532 = vmatprep.subr.mxu0 %v730_v0  ;;  %564 = vmatpush3.msra.mxu1 %v209_v22  ;;  %v467_v22 = vld [vmem:[%s886_s4] ss:$0 sm:$0xff] }
  0x34   :  { %533 = vmatpush3.msra.mxu0 %v81_v7  ;;  %565 = vmatprep.subr.mxu1 %v730_v0  ;;  %v370_v7 = vld [vmem:[#allocation7 + $0x70] sm:$0xff] }
  0x35   :  { %534 = vmatprep.subr.mxu0 %v730_v0  ;;  %566 = vmatpush3.msra.mxu1 %v208_v23 }
  0x36   :  { %535 = vmatpush3.msra.mxu0 %v80_v8  ;;  %567 = vmatprep.subr.mxu1 %v730_v0  ;;  %v369_v8 = vld [vmem:[#allocation7 + $0x68] sm:$0xff] }
  0x37   :  { %536 = vmatprep.subr.mxu0 %v730_v0  ;;  %568 = vmatpush3.msra.mxu1 %v207_v24 }
  0x38   :  { %537 = vmatpush3.msra.mxu0 %v79_v9  ;;  %569 = vmatprep.subr.mxu1 %v730_v0  ;;  %v368_v9 = vld [vmem:[#allocation7 + $0x60] sm:$0xff] }
  0x39   :  { %538 = vmatprep.subr.mxu0 %v730_v0  ;;  %570 = vmatpush3.msra.mxu1 %v206_v25 }
  0x3a   :  { %539 = vmatpush3.msra.mxu0 %v78_v10  ;;  %571 = vmatprep.subr.mxu1 %v730_v0  ;;  %v367_v10 = vld [vmem:[#allocation7 + $0x58] sm:$0xff] }
  0x3b   :  { %540 = vmatprep.subr.mxu0 %v730_v0  ;;  %572 = vmatpush3.msra.mxu1 %v205_v26 }
  0x3c   :  { %541 = vmatpush3.msra.mxu0 %v77_v11  ;;  %573 = vmatprep.subr.mxu1 %v730_v0  ;;  %v366_v11 = vld [vmem:[#allocation7 + $0x50] sm:$0xff] }
  0x3d   :  { %542 = vmatprep.subr.mxu0 %v730_v0  ;;  %574 = vmatpush3.msra.mxu1 %v204_v27 }
  0x3e   :  { %543 = vmatpush3.msra.mxu0 %v76_v12  ;;  %575 = vmatprep.subr.mxu1 %v730_v0  ;;  %v365_v12 = vld [vmem:[#allocation7 + $0x48] sm:$0xff] }
  0x3f   :  { %544 = vmatprep.subr.mxu0 %v730_v0  ;;  %576 = vmatpush3.msra.mxu1 %v203_v28 }
  0x40   :  { %545 = vmatpush3.msra.mxu0 %v75_v13  ;;  %577 = vmatprep.subr.mxu1 %v730_v0  ;;  %v364_v13 = vld [vmem:[#allocation7 + $0x40] sm:$0xff] }
  0x41   :  { %546 = vmatprep.subr.mxu0 %v730_v0  ;;  %578 = vmatpush3.msra.mxu1 %v202_v29 }
  0x42   :  { %547 = vmatpush3.msra.mxu0 %v74_v14  ;;  %579 = vmatprep.subr.mxu1 %v730_v0  ;;  %v363_v14 = vld [vmem:[#allocation7 + $0x38] sm:$0xff] }
  0x43   :  { %548 = vmatprep.subr.mxu0 %v730_v0  ;;  %580 = vmatpush3.msra.mxu1 %v201_v30 }
  0x44   :  { %549 = vmatpush3.msra.mxu0 %v73_v15  ;;  %581 = vmatprep.subr.mxu1 %v730_v0  ;;  %v362_v15 = vld [vmem:[#allocation7 + $0x30] sm:$0xff] }
  0x45   :  { %550 = vmatprep.subr.mxu0 %v730_v0  ;;  %582 = vmatpush3.msra.mxu1 %v200_v31 }
  0x46   :  { %551 = vmatpush3.msra.mxu0 %v72_v16  ;;  %583 = vmatprep.subr.mxu1 %v730_v0  ;;  %v361_v16 = vld [vmem:[#allocation7 + $0x28] sm:$0xff] }
  0x47   :  { %553 = vmatmul.mubr.f32.vlgmr.msra.gmra.mxu0 %v71_v17  ;;  %590 = vmatprep.subr.mxu0 %v730_v0  ;;  %v360_v17 = vld [vmem:[#allocation7 + $0x20] sm:$0xff] }
  0x48   :  { %622 = vmatprep.mubr.msk.f32.mxu0 %vm731_vm0, %v730_v0  ;;  %584 = vmatpush3.msra.mxu1 %v199_v32 }
  0x49   :  { %585 = vmatprep.subr.mxu1 %v730_v0  ;;  %591 = vmatpush3.msra.mxu0 %v371_v6 }
  0x4a   :  { %586 = vmatpush3.msra.mxu1 %v198_v33  ;;  %592 = vmatprep.subr.mxu0 %v730_v0 }
  0x4b   :  { %593 = vmatpush3.msra.mxu0 %v370_v7 }
  0x4c   :  { %594 = vmatprep.subr.mxu0 %v730_v0 }
  0x4d   :  { %595 = vmatpush3.msra.mxu0 %v369_v8  ;;  %v323_v8 = vld [vmem:[%s887_s5] sm:$0x1] }
  0x4e   :  { %596 = vmatprep.subr.mxu0 %v730_v0 }
  0x4f   :  { %597 = vmatpush3.msra.mxu0 %v368_v9 }
  0x50   :  { %598 = vmatprep.subr.mxu0 %v730_v0 }
  0x51   :  { %599 = vmatpush3.msra.mxu0 %v367_v10 }
  0x52   :  { %600 = vmatprep.subr.mxu0 %v730_v0 }
  0x53   :  { %601 = vmatpush3.msra.mxu0 %v366_v11  ;;  %v324_v11 = vld [vmem:[%s887_s5 + $0x1] sm:$0x1]  ;;  %s699_s5 = scalar_lea.vmem %s457_s15, 128 }
  0x54   :  { %602 = vmatprep.subr.mxu0 %v730_v0  ;;  %p700_p1 = scmp.ne.s32.totalorder %s457_s15, %s699_s5  ;;  %p705_p3 = scmp.lt.s32.totalorder %s699_s5, %s699_s5 }
  0x55   :  { %603 = vmatpush3.msra.mxu0 %v365_v12 }
  0x56   :  { %604 = vmatprep.subr.mxu0 %v730_v0  ;;  %p706_p4 = por %p705_p3, %p704_p2 }
  0x57   :  { %605 = vmatpush3.msra.mxu0 %v364_v13 }
  0x58   :  { %606 = vmatprep.subr.mxu0 %v730_v0  ;;  %p707_p5 = pnand %p706_p4, %p700_p1 }
  0x59   :  { %607 = vmatpush3.msra.mxu0 %v363_v14 }
  0x5a   :  { %608 = vmatprep.subr.mxu0 %v730_v0 }
  0x5b   :  { %609 = vmatpush3.msra.mxu0 %v362_v15 }
  0x5c   :  { %610 = vmatprep.subr.mxu0 %v730_v0 }
  0x5d   :  { %611 = vmatpush3.msra.mxu0 %v361_v16 }
  0x5e   :  { %612 = vmatprep.subr.mxu0 %v730_v0 }
  0x5f   :  { %613 = vmatpush3.msra.mxu0 %v360_v17 }
  0x60   :  { %614 = vmatprep.subr.mxu0 %v730_v0 }
  0x61   :  { %615 = vmatpush3.msra.mxu0 %v359_v18  ;;  %v468_v18 = vld [vmem:[%s889_s7] ss:$0 sm:$0xff] }
  0x62   :  { %616 = vmatprep.subr.mxu0 %v730_v0 }
  0x63   :  { %617 = vmatpush3.msra.mxu0 %v358_v19 }
  0x64   :  { %618 = vmatprep.subr.mxu0 %v730_v0 }
  0x65   :  { %619 = vmatpush3.msra.mxu0 %v357_v20 }
  0x66   :  { %620 = vmatprep.subr.mxu0 %v730_v0 }
  0x67   :  { %621 = vmatpush3.msra.mxu0 %v356_v21 }
 0x107   :  { %v159_v35 = vpop.f32.mrf.mxu0 }
 0x108   :  { %v160_v36 = vadd.f32 %v466_v34, %v159_v35 }
 0x109   :  { %v554_v37 = vpop.f32.mrf.mxu0 }
 0x10a   :  { %v163_v38 = vmax.f32 %v160_v36, 0.0 }
 0x10c   :  { %v166_v39 = vrot.slane %v163_v38, 4 }
 0x10e   :  { %v167_v40 = vadd.f32 %v166_v39, %v163_v38 }
 0x110   :  { %v168_v41 = vrot.slane %v167_v40, 2 }
 0x112   :  { %v169_v42 = vadd.f32 %v168_v41, %v167_v40 }
 0x114   :  { %v170_v43 = vrot.slane %v169_v42, 1 }
 0x116   :  { %v171_v44 = vadd.f32 %v170_v43, %v169_v42  ;;  %v290_v43 = vld [vmem:[%s886_s4 + $0x1] sm:$0x1] }
 0x118   :  { %v173_v45 = vmul.f32 0.125, %v171_v44 }
 0x11a   :  { %v174_v46 = vsub.f32 %v163_v38, %v173_v45 }
 0x11c   :  { %v175_v47 = vmul.f32 %v174_v46, %v174_v46  ;;  %v291_v46 = vld [vmem:[%s886_s4 + $0x2] sm:$0x1] }
 0x11e   :  { %v176_v48 = vrot.slane %v175_v47, 4 }
 0x120   :  { %v177_v49 = vadd.f32 %v176_v48, %v175_v47 }
 0x122   :  { %v178_v50 = vrot.slane %v177_v49, 2 }
 0x124   :  { %v179_v51 = vadd.f32 %v178_v50, %v177_v49 }
 0x126   :  { %v180_v52 = vrot.slane %v179_v51, 1 }
 0x128   :  { %v181_v53 = vadd.f32 %v180_v52, %v179_v51 }
 0x12a   :  { %v182_v54 = vmul.f32 0.125, %v181_v53 }
 0x12c   :  { %v183_v55 = vadd.f32 1e-05, %v182_v54 }
 0x12e   :  { %633 = vrsqrt.f32 %v183_v55 }
 0x13b   :  { %v634_v60 = vpop.eup %633 }
 0x13c   :  { %v185_v61 = vmul.f32 %v634_v60, %v164_v58 }
 0x13e   :  { %v186_v63 = vmul.f32 %v185_v61, %v173_v45  ;;  %v191_v1 = vrot.slane %v185_v61, %v835_v59 }
 0x140   :  { %v187_v2 = vsub.f32 %v165_v62, %v186_v63  ;;  %v192_v3 = vmul.f32 %v191_v1, %v163_v38 }
 0x142   :  { %v196_v4 = vrot.slane %v187_v2, %v835_v59 }
 0x144   :  { %v197_v5 = vadd.f32 %v196_v4, %v192_v3 }
 0x146   :  { %588 = vmatmul.mubr.f32.vlgmr.msra.gmra.mxu1 %v197_v5 }
 0x206   :  { %v285_v23 = vpop.f32.mrf.mxu1 }
 0x207   :  { %v286_v24 = vadd.f32 %v467_v22, %v285_v23 }
 0x208   :  { %v589_v25 = vpop.f32.mrf.mxu1 }
 0x209   :  { %v289_v26 = vmax.f32 %v286_v24, 0.0 }
 0x20b   :  { %v292_v27 = vrot.slane %v289_v26, 4 }
 0x20d   :  { %v293_v28 = vadd.f32 %v292_v27, %v289_v26 }
 0x20f   :  { %v294_v29 = vrot.slane %v293_v28, 2 }
 0x211   :  { %v295_v30 = vadd.f32 %v294_v29, %v293_v28 }
 0x213   :  { %v296_v31 = vrot.slane %v295_v30, 1 }
 0x215   :  { %v297_v32 = vadd.f32 %v296_v31, %v295_v30 }
 0x217   :  { %v298_v33 = vmul.f32 0.125, %v297_v32 }
 0x219   :  { %v299_v34 = vsub.f32 %v289_v26, %v298_v33 }
 0x21b   :  { %v300_v35 = vmul.f32 %v299_v34, %v299_v34 }
 0x21d   :  { %v301_v36 = vrot.slane %v300_v35, 4 }
 0x21f   :  { %v302_v0 = vadd.f32 %v301_v36, %v300_v35 }
 0x221   :  { %v303_v37 = vrot.slane %v302_v0, 2 }
 0x223   :  { %v304_v38 = vadd.f32 %v303_v37, %v302_v0 }
 0x225   :  { %v305_v39 = vrot.slane %v304_v38, 1 }
 0x227   :  { %v306_v40 = vadd.f32 %v305_v39, %v304_v38 }
 0x229   :  { %v307_v41 = vmul.f32 0.125, %v306_v40 }
 0x22b   :  { %v308_v42 = vadd.f32 1e-05, %v307_v41 }
 0x22d   :  { %635 = vrsqrt.f32 %v308_v42 }
 0x23a   :  { %v636_v44 = vpop.eup %635 }
 0x23b   :  { %v310_v45 = vmul.f32 %v636_v44, %v290_v43 }
 0x23d   :  { %v311_v47 = vmul.f32 %v310_v45, %v298_v33  ;;  %v316_v48 = vrot.slane %v310_v45, %v835_v59 }
 0x23f   :  { %v312_v49 = vsub.f32 %v291_v46, %v311_v47  ;;  %v317_v50 = vmul.f32 %v316_v48, %v289_v26 }
 0x241   :  { %v321_v51 = vrot.slane %v312_v49, %v835_v59 }
 0x243   :  { %v322_v52 = vadd.f32 %v321_v51, %v317_v50 }
 0x245   :  { %v325_v53 = vrot.slane %v322_v52, 4 }
 0x247   :  { %v326_v54 = vadd.f32 %v325_v53, %v322_v52 }
 0x249   :  { %v327_v55 = vrot.slane %v326_v54, 2 }
 0x24b   :  { %v328_v56 = vadd.f32 %v327_v55, %v326_v54 }
 0x24d   :  { %v329_v57 = vrot.slane %v328_v56, 1 }
 0x24f   :  { %v330_v58 = vadd.f32 %v329_v57, %v328_v56 }
 0x251   :  { %v331_v60 = vmul.f32 0.125, %v330_v58 }
 0x253   :  { %v332_v61 = vsub.f32 %v322_v52, %v331_v60 }
 0x255   :  { %v333_v62 = vmul.f32 %v332_v61, %v332_v61 }
 0x257   :  { %v334_v63 = vrot.slane %v333_v62, 4 }
 0x259   :  { %v335_v1 = vadd.f32 %v334_v63, %v333_v62 }
 0x25b   :  { %v336_v2 = vrot.slane %v335_v1, 2 }
 0x25d   :  { %v337_v3 = vadd.f32 %v336_v2, %v335_v1 }
 0x25f   :  { %v338_v4 = vrot.slane %v337_v3, 1 }
 0x261   :  { %v339_v5 = vadd.f32 %v338_v4, %v337_v3 }
 0x263   :  { %v340_v6 = vmul.f32 0.125, %v339_v5 }
 0x265   :  { %v341_v7 = vadd.f32 1e-05, %v340_v6 }
 0x267   :  { %637 = vrsqrt.f32 %v341_v7 }
 0x274   :  { %v638_v9 = vpop.eup %637 }
 0x275   :  { %v343_v10 = vmul.f32 %v638_v9, %v323_v8 }
 0x277   :  { %v344_v12 = vmul.f32 %v343_v10, %v331_v60  ;;  %v349_v13 = vrot.slane %v343_v10, %v835_v59 }
 0x279   :  { %v345_v14 = vsub.f32 %v324_v11, %v344_v12  ;;  %v350_v15 = vmul.f32 %v349_v13, %v322_v52 }
 0x27b   :  { %v354_v16 = vrot.slane %v345_v14, %v835_v59 }
 0x27d   :  { %v355_v17 = vadd.f32 %v354_v16, %v350_v15 }
 0x27f   :  { %623 = vmatmul.mubr.f32.vlgmr.msra.gmra.mxu0 %v355_v17 }
 0x33f   :  { %v445_v19 = vpop.f32.mrf.mxu0 }
 0x340   :  { %v446_v20 = vadd.f32 %v468_v18, %v445_v19 }
 0x341   :  { %v624_v21 = vpop.f32.mrf.mxu0 }
 0x342   :  { %449 = vst [vmem:[#allocation8] sm:$0xff] %v446_v20 }
 0x343   :  { %710 = shalt.err (!%p707_p5)
}
 0x344   :  { %459 = dma.vmem_to_hbm [thread:$0]  %s457_s15, 128, %s890_s8, [#allocation4]  }
 0x345   :  { %723 = dma.done.wait [#allocation4], 128  }
 0x346   :  { %724 = vsyncadd [#allocation4], 4294967168 }
 0x347   :  { %463 = vsyncpa [#allocation3], 1 }
 0x348   :  { %464 = vsyncpa [#allocation6], 1 }
 0x349   :  { %465 = vsyncpa [#allocation4], 1 }

</bundles_post_ra>
